<compile_context>
chip_gen: v7x
topology: tpu7x:2x2x1
jax: 0.10.0
libtpu: 0.0.40
codegen_flags: <defaults>
</compile_context>

<pallas_src>
import jax
import jax.numpy as jnp
from jax.experimental import pallas as pl
from jax.experimental.pallas import tpu as pltpu


_LANES = 1024            # lane-dense last dim (multiple of 128)
_MAX_TM = 512            # up to (512, 1024) f32 = 2 MiB per tile buffer
_MIN_PALLAS_SIZE = 8 * 128   # below this, plain JAX is strictly faster


def _add_one_kernel(x_ref, o_ref):
    # Elementwise add on the whole VMEM tile (VPU op).
    o_ref[...] = x_ref[...] + jnp.asarray(1, dtype=o_ref.dtype)


def add_one(x: jax.Array) -> jax.Array:
    """Pallas equivalent of MyModel.forward: x + 1 (same shape/dtype)."""
    # Scalar / tiny path: kernel launch + DMA setup can never pay off here.
    if x.size < _MIN_PALLAS_SIZE:
        return x + jnp.asarray(1, dtype=x.dtype)

    orig_shape = x.shape
    dtype = x.dtype
    n = x.size

    # Flatten to a sublane- and lane-dense 2-D slab: (rows, 1024).
    rows = pl.cdiv(n, _LANES)

    # Row-tile size: target up to 512 rows (~2 MiB f32 per buffer), rounded
    # up to a multiple of 32 so the (sublane, lane) block constraint holds
    # for any dtype packing.
    tm = min(_MAX_TM, rows)
    tm = ((tm + 31) // 32) * 32

    # Pad the row count to a multiple of the tile so every block is full
    # (keeps all stores unmasked / lane-dense).
    rows_padded = ((rows + tm - 1) // tm) * tm
    n_padded = rows_padded * _LANES

    flat = jnp.reshape(x, (-1,))
    if n_padded != n:
        flat = jnp.pad(flat, (0, n_padded - n))
    slab = jnp.reshape(flat, (rows_padded, _LANES))

    grid = (rows_padded // tm,)

    out = pl.pallas_call(
        _add_one_kernel,
        out_shape=jax.ShapeDtypeStruct((rows_padded, _LANES), dtype),
        grid_spec=pltpu.PrefetchScalarGridSpec(
            num_scalar_prefetch=0,
            grid=grid,
            in_specs=[pl.BlockSpec((tm, _LANES), lambda i: (i, 0))],
            out_specs=pl.BlockSpec((tm, _LANES), lambda i: (i, 0)),
        ),
        compiler_params=pltpu.CompilerParams(
            # Data-parallel grid: lets v7x shard row-tiles across both TCs.
            dimension_semantics=("parallel",),
        ),
    )(slab)

    out_flat = jnp.reshape(out, (-1,))[:n]
    return jnp.reshape(out_flat, orig_shape)


if __name__ == "__main__":
    key = jax.random.PRNGKey(0)

    # 1) Matches the PyTorch usage exactly: x = torch.tensor(1.0) (0-D scalar).
    #    Tiny input -> plain-JAX fast path.
    x_scalar = jnp.asarray(1.0, dtype=jnp.float32)
    y_scalar = jax.block_until_ready(add_one(x_scalar))
    expected_scalar = x_scalar + 1.0
    assert y_scalar.shape == expected_scalar.shape
    assert y_scalar.dtype == expected_scalar.dtype
    assert bool(jnp.allclose(y_scalar, expected_scalar)), (y_scalar, expected_scalar)

    # 2) Small NCHW-like tensor -> goes through the Pallas kernel (padded slab).
    k1, k2 = jax.random.split(key)
    x_tensor = jax.random.normal(k1, (2, 4, 16, 16), dtype=jnp.float32)
    y_tensor = jax.block_until_ready(add_one(x_tensor))
    assert y_tensor.shape == x_tensor.shape and y_tensor.dtype == x_tensor.dtype
    assert bool(jnp.allclose(y_tensor, x_tensor + 1.0))

    # 3) Larger slab -> multi-step grid (exercises tiling / pipelining path).
    x_large = jax.random.normal(k2, (512, 1024), dtype=jnp.float32)
    y_large = jax.block_until_ready(add_one(x_large))
    assert y_large.shape == x_large.shape and y_large.dtype == x_large.dtype
    assert bool(jnp.allclose(y_large, x_large + 1.0))

    print("KERNEL_OK")
</pallas_src>

<mosaic_0001>
module attributes {stable_mosaic.version = 11 : i64} {
  func.func @_add_one_kernel(%arg0: i32, %arg1: memref<32x1024xf32, #tpu.memory_space<vmem>>, %arg2: memref<32x1024xf32, #tpu.memory_space<vmem>>) attributes {dimension_semantics = [#tpu.dimension_semantics<parallel>], iteration_bounds = array<i64: 1>, scalar_prefetch = 0 : i64, scratch_operands = 0 : i64, tpu.core_type = #tpu.core_type<tc>, window_params = [{transform_indices = @transform_0, window_bounds = array<i64: 32, 1024>}, {transform_indices = @transform_1, window_bounds = array<i64: 32, 1024>}]} {
    %c0 = arith.constant 0 : index
    %c0_0 = arith.constant 0 : index
    %0 = vector.load %arg1[%c0, %c0_0] : memref<32x1024xf32, #tpu.memory_space<vmem>>, vector<32x1024xf32>
    %cst = arith.constant 1.000000e+00 : f32
    %1 = vector.broadcast %cst : f32 to vector<32x1024xf32>
    %2 = arith.addf %0, %1 : vector<32x1024xf32>
    %c0_1 = arith.constant 0 : index
    %c0_2 = arith.constant 0 : index
    %3 = vector.load %arg2[%c0_1, %c0_2] : memref<32x1024xf32, #tpu.memory_space<vmem>>, vector<32x1024xf32>
    tpu.vector_store %arg2[%c0_1, %c0_2], %2 {strides = array<i32>} : memref<32x1024xf32, #tpu.memory_space<vmem>>, vector<32x1024xf32>,
    return
  }
  func.func @transform_0(%arg0: i32) -> (i32, i32) {
    %c0_i32 = arith.constant 0 : i32
    %c0_i32_0 = arith.constant 0 : i32
    return %arg0, %c0_i32 : i32, i32
  }
  func.func @transform_1(%arg0: i32) -> (i32, i32) {
    %c0_i32 = arith.constant 0 : i32
    %c0_i32_0 = arith.constant 0 : i32
    return %arg0, %c0_i32 : i32, i32
  }
}

</mosaic_0001>

<bundles_post_ra>
// kernel: tpu_custom_call.1
= control target key start
LH: loop header
LB: loop body
LE: loop exit
PB: predicated region body
PF: predicated region fallthrough
CT: control target
= control target key end

     0   :  { %6 = vsyncpa [#allocation3], 0  ;;  %s235_s0 = inlined_call_operand.hbm [shape: f32[32,1024], index: 0, kind: input, shape index: {}]   ;;  %s236_s1 = inlined_call_operand.hbm [shape: f32[32,1024], index: 1, kind: output, shape index: {}]  }
   0x1   :  { %7 = vsyncpa [#allocation4], 0  ;;  %s188_s6 = smov [#allocation2]   ;;  %s140_s10 = scalar_lea.hbm %s235_s0, 4096 }
   0x2   :  { %s13_s7 = sshll.u32 %s188_s6, 4  ;;  %p141_p0 = scmp.ne.s32.totalorder %s235_s0, %s140_s10  ;;  %s14_s7 = int_to_ptr.vmem [resolvable:$true] %s13_s7 }
   0x3   :  { %p144_p1 = scmp.lt.u32.totalorder %s140_s10, %s235_s0 }
   0x5   :  { %p146_p2 = pnand %p144_p1, %p141_p0 }
   0x7   :  { %149 = shalt.err (!%p146_p2)
}
   0x8   :  { %s150_s15 = scalar_lea.vmem %s14_s7, 4096  ;;  %p155_p4 = scmp.lt.s32.totalorder %s14_s7, %s14_s7 }
   0x9   :  { %p151_p3 = scmp.ne.s32.totalorder %s14_s7, %s150_s15  ;;  %p156_p5 = scmp.lt.s32.totalorder %s150_s15, %s150_s15 }
   0xb   :  { %p157_p6 = por %p156_p5, %p155_p4 }
   0xd   :  { %p158_p7 = pnand %p157_p6, %p151_p3 }
   0xf   :  { %161 = shalt.err (!%p158_p7)
}
  0x10   :  { %s189_s16 = smov 1024   ;;  %s190_s17 = smov 64  }
  0x11   :  { %19 = dma.hbm_to_vmem [thread:$0]  %s235_s0, 4096, %s14_s7, [#allocation3], %s189_s16, %s189_s16, %s190_s17  }
  0x12   :  { %184 = dma.done.wait [#allocation3], 4096  }
  0x13   :  { %185 = vsyncadd [#allocation3], 4294963200  ;;  %v23_v0 = vld [vmem:[#allocation2] sm:$0xff]  ;;  %v24_v1 = vld [vmem:[#allocation2 + $0x8] sm:$0xff]  ;;  %s191_s20 = smov [#allocation5]  }
  0x14   :  { %v25_v2 = vld [vmem:[#allocation2 + $0x10] sm:$0xff]  ;;  %s217_s21 = sshll.u32 %s191_s20, 4  ;;  %v55_v3 = vadd.f32 1.0, %v23_v0  ;;  %v56_v4 = vadd.f32 1.0, %v24_v1  ;;  %v26_v6 = vld [vmem:[#allocation2 + $0x18] sm:$0xff]  ;;  %v27_v7 = vld [vmem:[#allocation2 + $0x20] sm:$0xff]  ;;  %s125_s21 = int_to_ptr.vmem [resolvable:$true] %s217_s21 }
  0x15   :  { %v57_v5 = vadd.f32 1.0, %v25_v2  ;;  %v28_v8 = vld [vmem:[#allocation2 + $0x28] sm:$0xff]  ;;  %v58_v9 = vadd.f32 1.0, %v26_v6  ;;  %v59_v10 = vadd.f32 1.0, %v27_v7  ;;  %v29_v12 = vld [vmem:[#allocation2 + $0x30] sm:$0xff]  ;;  %v30_v13 = vld [vmem:[#allocation2 + $0x38] sm:$0xff]  ;;  %p167_p9 = scmp.lt.s32.totalorder %s125_s21, %s125_s21 }
  0x16   :  { %v60_v11 = vadd.f32 1.0, %v28_v8  ;;  %v31_v14 = vld [vmem:[#allocation2 + $0x40] sm:$0xff]  ;;  %87 = vst [vmem:[#allocation5] sm:$0xff] %v55_v3  ;;  %88 = vst [vmem:[#allocation5 + $0x8] sm:$0xff] %v56_v4  ;;  %v61_v15 = vadd.f32 1.0, %v29_v12  ;;  %v62_v16 = vadd.f32 1.0, %v30_v13 }
  0x17   :  { %89 = vst [vmem:[#allocation5 + $0x10] sm:$0xff] %v57_v5  ;;  %v63_v17 = vadd.f32 1.0, %v31_v14  ;;  %v32_v18 = vld [vmem:[#allocation2 + $0x48] sm:$0xff]  ;;  %v33_v19 = vld [vmem:[#allocation2 + $0x50] sm:$0xff]  ;;  %v34_v20 = vld [vmem:[#allocation2 + $0x58] sm:$0xff]  ;;  %s162_s0 = scalar_lea.vmem %s125_s21, 4096 }
  0x18   :  { %90 = vst [vmem:[#allocation5 + $0x18] sm:$0xff] %v58_v9  ;;  %91 = vst [vmem:[#allocation5 + $0x20] sm:$0xff] %v59_v10  ;;  %v64_v21 = vadd.f32 1.0, %v32_v18  ;;  %v65_v22 = vadd.f32 1.0, %v33_v19  ;;  %v66_v23 = vadd.f32 1.0, %v34_v20  ;;  %v35_v24 = vld [vmem:[#allocation2 + $0x60] sm:$0xff]  ;;  %p163_p8 = scmp.ne.s32.totalorder %s125_s21, %s162_s0  ;;  %p168_p10 = scmp.lt.s32.totalorder %s162_s0, %s162_s0 }
  0x19   :  { %92 = vst [vmem:[#allocation5 + $0x28] sm:$0xff] %v60_v11  ;;  %v36_v25 = vld [vmem:[#allocation2 + $0x68] sm:$0xff]  ;;  %v37_v26 = vld [vmem:[#allocation2 + $0x70] sm:$0xff]  ;;  %93 = vst [vmem:[#allocation5 + $0x30] sm:$0xff] %v61_v15  ;;  %v67_v27 = vadd.f32 1.0, %v35_v24 }
  0x1a   :  { %94 = vst [vmem:[#allocation5 + $0x38] sm:$0xff] %v62_v16  ;;  %95 = vst [vmem:[#allocation5 + $0x40] sm:$0xff] %v63_v17  ;;  %v68_v28 = vadd.f32 1.0, %v36_v25  ;;  %v69_v29 = vadd.f32 1.0, %v37_v26  ;;  %v38_v30 = vld [vmem:[#allocation2 + $0x78] sm:$0xff]  ;;  %v39_v31 = vld [vmem:[#allocation2 + $0x80] sm:$0xff]  ;;  %p169_p11 = por %p168_p10, %p167_p9 }
  0x1b   :  { %v40_v32 = vld [vmem:[#allocation2 + $0x88] sm:$0xff]  ;;  %96 = vst [vmem:[#allocation5 + $0x48] sm:$0xff] %v64_v21  ;;  %97 = vst [vmem:[#allocation5 + $0x50] sm:$0xff] %v65_v22  ;;  %v70_v33 = vadd.f32 1.0, %v38_v30  ;;  %v71_v34 = vadd.f32 1.0, %v39_v31  ;;  %v41_v36 = vld [vmem:[#allocation2 + $0x90] sm:$0xff] }
  0x1c   :  { %98 = vst [vmem:[#allocation5 + $0x58] sm:$0xff] %v66_v23  ;;  %v72_v35 = vadd.f32 1.0, %v40_v32  ;;  %v42_v37 = vld [vmem:[#allocation2 + $0x98] sm:$0xff]  ;;  %v43_v38 = vld [vmem:[#allocation2 + $0xa0] sm:$0xff]  ;;  %99 = vst [vmem:[#allocation5 + $0x60] sm:$0xff] %v67_v27  ;;  %v73_v39 = vadd.f32 1.0, %v41_v36  ;;  %p170_p12 = pnand %p169_p11, %p163_p8 }
  0x1d   :  { %100 = vst [vmem:[#allocation5 + $0x68] sm:$0xff] %v68_v28  ;;  %101 = vst [vmem:[#allocation5 + $0x70] sm:$0xff] %v69_v29  ;;  %v74_v40 = vadd.f32 1.0, %v42_v37  ;;  %v75_v41 = vadd.f32 1.0, %v43_v38  ;;  %v44_v42 = vld [vmem:[#allocation2 + $0xa8] sm:$0xff]  ;;  %v45_v43 = vld [vmem:[#allocation2 + $0xb0] sm:$0xff] }
  0x1e   :  { %v46_v44 = vld [vmem:[#allocation2 + $0xb8] sm:$0xff]  ;;  %102 = vst [vmem:[#allocation5 + $0x78] sm:$0xff] %v70_v33  ;;  %103 = vst [vmem:[#allocation5 + $0x80] sm:$0xff] %v71_v34  ;;  %v76_v45 = vadd.f32 1.0, %v44_v42  ;;  %v77_v46 = vadd.f32 1.0, %v45_v43  ;;  %v47_v48 = vld [vmem:[#allocation2 + $0xc0] sm:$0xff] }
  0x1f   :  { %104 = vst [vmem:[#allocation5 + $0x88] sm:$0xff] %v72_v35  ;;  %v78_v47 = vadd.f32 1.0, %v46_v44  ;;  %v48_v49 = vld [vmem:[#allocation2 + $0xc8] sm:$0xff]  ;;  %v49_v50 = vld [vmem:[#allocation2 + $0xd0] sm:$0xff]  ;;  %105 = vst [vmem:[#allocation5 + $0x90] sm:$0xff] %v73_v39  ;;  %v79_v51 = vadd.f32 1.0, %v47_v48 }
  0x20   :  { %106 = vst [vmem:[#allocation5 + $0x98] sm:$0xff] %v74_v40  ;;  %107 = vst [vmem:[#allocation5 + $0xa0] sm:$0xff] %v75_v41  ;;  %v80_v52 = vadd.f32 1.0, %v48_v49  ;;  %v81_v53 = vadd.f32 1.0, %v49_v50  ;;  %v50_v54 = vld [vmem:[#allocation2 + $0xd8] sm:$0xff]  ;;  %v51_v55 = vld [vmem:[#allocation2 + $0xe0] sm:$0xff] }
  0x21   :  { %v52_v56 = vld [vmem:[#allocation2 + $0xe8] sm:$0xff]  ;;  %108 = vst [vmem:[#allocation5 + $0xa8] sm:$0xff] %v76_v45  ;;  %109 = vst [vmem:[#allocation5 + $0xb0] sm:$0xff] %v77_v46  ;;  %v82_v57 = vadd.f32 1.0, %v50_v54  ;;  %v83_v58 = vadd.f32 1.0, %v51_v55  ;;  %v53_v60 = vld [vmem:[#allocation2 + $0xf0] sm:$0xff] }
  0x22   :  { %110 = vst [vmem:[#allocation5 + $0xb8] sm:$0xff] %v78_v47  ;;  %v84_v59 = vadd.f32 1.0, %v52_v56  ;;  %v54_v61 = vld [vmem:[#allocation2 + $0xf8] sm:$0xff]  ;;  %111 = vst [vmem:[#allocation5 + $0xc0] sm:$0xff] %v79_v51  ;;  %v85_v62 = vadd.f32 1.0, %v53_v60 }
  0x23   :  { %112 = vst [vmem:[#allocation5 + $0xc8] sm:$0xff] %v80_v52  ;;  %113 = vst [vmem:[#allocation5 + $0xd0] sm:$0xff] %v81_v53  ;;  %v86_v63 = vadd.f32 1.0, %v54_v61 }
  0x24   :  { %114 = vst [vmem:[#allocation5 + $0xd8] sm:$0xff] %v82_v57  ;;  %115 = vst [vmem:[#allocation5 + $0xe0] sm:$0xff] %v83_v58 }
  0x25   :  { %116 = vst [vmem:[#allocation5 + $0xe8] sm:$0xff] %v84_v59  ;;  %117 = vst [vmem:[#allocation5 + $0xf0] sm:$0xff] %v85_v62 }
  0x26   :  { %118 = vst [vmem:[#allocation5 + $0xf8] sm:$0xff] %v86_v63 }
  0x27   :  { %173 = shalt.err (!%p170_p12)
}
  0x28   :  { %s174_s24 = scalar_lea.hbm %s236_s1, 4096 }
  0x29   :  { %p175_p13 = scmp.ne.s32.totalorder %s236_s1, %s174_s24  ;;  %p178_p0 = scmp.lt.u32.totalorder %s174_s24, %s236_s1 }
  0x2b   :  { %p180_p1 = pnand %p178_p0, %p175_p13 }
  0x2d   :  { %183 = shalt.err (!%p180_p1)
}
  0x2e   :  { %130 = dma.vmem_to_hbm [thread:$0]  %s125_s21, 4096, %s236_s1, [#allocation4], %s189_s16, %s189_s16, %s190_s17  }
  0x2f   :  { %186 = dma.done.wait [#allocation4], 4096  }
  0x30   :  { %187 = vsyncadd [#allocation4], 4294963200 }
  0x31   :  { %134 = vsyncpa [#allocation3], 1 }
  0x32   :  { %135 = vsyncpa [#allocation4], 1 }

</bundles_post_ra>
